<compile_context>
chip_gen: v7x
topology: tpu7x:2x2x1
jax: 0.10.0
libtpu: 0.0.40
codegen_flags: <defaults>
</compile_context>

<pallas_src>
import functools
import math

import jax
import jax.numpy as jnp
from jax import lax
from jax.experimental import pallas as pl
from jax.experimental.pallas import tpu as pltpu

_VMEM_LIMIT = 48 * 1024 * 1024  # <= v7x 64 MiB/TC physical, > v5e/v6e scoped defaults


def _pick_tile(dim, pref, align):
    """Full dim if small; otherwise the largest divisor of `dim` that is a multiple
    of `align` and <= pref; falls back to the full dim (always legal)."""
    if dim <= pref:
        return dim
    t = (pref // align) * align
    while t >= align:
        if dim % t == 0:
            return t
        t -= align
    return dim


# ------------------------------------------------------------------
# Tiled linear kernel:  y = x @ W + b    (x: (M, K), W: (K, N), b: (N,))
# ------------------------------------------------------------------
def _linear_kernel(x_ref, w_ref, b_ref, o_ref, acc_ref):
    @pl.when(pl.program_id(2) == 0)
    def _():
        acc_ref[...] = jnp.zeros_like(acc_ref)

    acc_ref[...] += jnp.dot(x_ref[...], w_ref[...],
                            preferred_element_type=jnp.float32)

    @pl.when(pl.program_id(2) == pl.num_programs(2) - 1)
    def _():
        o_ref[...] = (acc_ref[...] + b_ref[...].astype(jnp.float32)).astype(o_ref.dtype)


def pallas_linear(x, w, b, *, tm_pref=256, tn_pref=256, tk_pref=512):
    """x: (M, K); w: (K, N); b: (N,) -> (M, N).  Operand dtype preserved."""
    M, K = x.shape
    K2, N = w.shape
    assert K == K2 and b.shape == (N,)
    tm = _pick_tile(M, tm_pref, 8)
    tn = _pick_tile(N, tn_pref, 128)
    tk = _pick_tile(K, tk_pref, 128)

    cost = pl.CostEstimate(
        flops=2 * M * N * K,
        transcendentals=0,
        bytes_accessed=(M * K + K * N + M * N) * x.dtype.itemsize + N * b.dtype.itemsize,
    )
    return pl.pallas_call(
        _linear_kernel,
        out_shape=jax.ShapeDtypeStruct((M, N), x.dtype),
        grid_spec=pltpu.PrefetchScalarGridSpec(
            num_scalar_prefetch=0,
            grid=(M // tm, N // tn, K // tk),
            in_specs=[
                pl.BlockSpec((tm, tk), lambda i, j, k: (i, k)),
                pl.BlockSpec((tk, tn), lambda i, j, k: (k, j)),
                pl.BlockSpec((1, tn), lambda i, j, k: (0, j)),
            ],
            out_specs=pl.BlockSpec((tm, tn), lambda i, j, k: (i, j)),
            scratch_shapes=[pltpu.VMEM((tm, tn), jnp.float32)],
        ),
        compiler_params=pltpu.CompilerParams(
            dimension_semantics=("parallel", "parallel", "arbitrary"),
            vmem_limit_bytes=_VMEM_LIMIT,
        ),
        cost_estimate=cost,
    )(x, w, b.reshape(1, N))


# ------------------------------------------------------------------
# Flash-style attention kernel on (B, H, S, d_k) layout.
#   grid = (B, H, S_q//tq, S_kv//tkv); KV axis is the reduction ("arbitrary").
#   Running max / sum / accumulator live in VMEM scratch; the full SxS score
#   matrix is never materialized.  Q is pre-scaled by 1/sqrt(d_k) outside.
# ------------------------------------------------------------------
def _flash_kernel(q_ref, k_ref, v_ref, *rest, has_bias):
    if has_bias:
        bias_ref, o_ref, m_ref, l_ref, acc_ref = rest
    else:
        o_ref, m_ref, l_ref, acc_ref = rest

    ki = pl.program_id(3)

    @pl.when(ki == 0)
    def _():
        m_ref[...] = jnp.full_like(m_ref, -jnp.inf)
        l_ref[...] = jnp.zeros_like(l_ref)
        acc_ref[...] = jnp.zeros_like(acc_ref)

    q = q_ref[0, 0]                                           # (tq, d_k), pre-scaled
    k = k_ref[0, 0]                                           # (tkv, d_k)
    v = v_ref[0, 0]                                           # (tkv, d_k)

    # Q @ K^T with K left untransposed: contract the last dim of both operands.
    s = lax.dot_general(q, k, (((1,), (1,)), ((), ())),
                        preferred_element_type=jnp.float32)   # (tq, tkv) f32
    if has_bias:
        s = s + bias_ref[0].astype(jnp.float32)

    m_prev = m_ref[...]                                       # (tq, 1)
    m_new = jnp.maximum(m_prev, jnp.max(s, axis=-1, keepdims=True))
    alpha = jnp.exp(m_prev - m_new)
    p = jnp.exp(s - m_new)                                    # (tq, tkv) f32
    l_ref[...] = alpha * l_ref[...] + jnp.sum(p, axis=-1, keepdims=True)
    m_ref[...] = m_new
    acc_ref[...] = alpha * acc_ref[...] + jnp.dot(
        p.astype(v.dtype), v, preferred_element_type=jnp.float32)

    @pl.when(ki == pl.num_programs(3) - 1)
    def _():
        # Exact normalization (approx reciprocal error can exceed test tolerance).
        o_ref[0, 0] = (acc_ref[...] / l_ref[...]).astype(o_ref.dtype)


def pallas_flash_attention(q, k, v, bias=None, *, tq_pref=256, tkv_pref=512):
    """q/k/v: (B, H, S, d_k), Q already scaled by 1/sqrt(d_k).
    bias: None, or (mB, S_q, S_kv) additive f32 with mB in {1, B} (broadcast over
    heads, and over batch if mB == 1).  Returns (B, H, S_q, d_k)."""
    B, H, Sq, d_k = q.shape
    Skv = k.shape[2]
    tq = _pick_tile(Sq, tq_pref, 8)
    tkv = _pick_tile(Skv, tkv_pref, 128)

    in_specs = [
        pl.BlockSpec((1, 1, tq, d_k), lambda b, h, qi, ki: (b, h, qi, 0)),
        pl.BlockSpec((1, 1, tkv, d_k), lambda b, h, qi, ki: (b, h, ki, 0)),
        pl.BlockSpec((1, 1, tkv, d_k), lambda b, h, qi, ki: (b, h, ki, 0)),
    ]
    inputs = [q, k, v]
    has_bias = bias is not None
    if has_bias:
        if bias.shape[0] == 1:
            bias_spec = pl.BlockSpec((1, tq, tkv), lambda b, h, qi, ki: (0, qi, ki))
        else:
            bias_spec = pl.BlockSpec((1, tq, tkv), lambda b, h, qi, ki: (b, qi, ki))
        in_specs.append(bias_spec)
        inputs.append(bias)

    kernel = functools.partial(_flash_kernel, has_bias=has_bias)
    cost = pl.CostEstimate(
        flops=4 * B * H * Sq * Skv * d_k,
        transcendentals=B * H * Sq * Skv,
        bytes_accessed=(2 * B * H * Sq * d_k + 2 * B * H * Skv * d_k) * q.dtype.itemsize
        + (bias.size * bias.dtype.itemsize if has_bias else 0),
    )
    return pl.pallas_call(
        kernel,
        out_shape=jax.ShapeDtypeStruct((B, H, Sq, d_k), q.dtype),
        grid_spec=pltpu.PrefetchScalarGridSpec(
            num_scalar_prefetch=0,
            grid=(B, H, Sq // tq, Skv // tkv),
            in_specs=in_specs,
            out_specs=pl.BlockSpec((1, 1, tq, d_k), lambda b, h, qi, ki: (b, h, qi, 0)),
            scratch_shapes=[
                pltpu.VMEM((tq, 1), jnp.float32),    # running max
                pltpu.VMEM((tq, 1), jnp.float32),    # running sum
                pltpu.VMEM((tq, d_k), jnp.float32),  # output accumulator
            ],
        ),
        compiler_params=pltpu.CompilerParams(
            dimension_semantics=("parallel", "parallel", "parallel", "arbitrary"),
            vmem_limit_bytes=_VMEM_LIMIT,
        ),
        cost_estimate=cost,
    )(*inputs)


# ------------------------------------------------------------------
# One-time parameter preprocessing (pre-transpose / pre-concat weights,
# fold 1/sqrt(d_k) into the Q projection).
# ------------------------------------------------------------------
def prepare_params(raw):
    h = raw["h"]
    D = raw["wq"].shape[0]
    d_k = D // h
    scale = 1.0 / math.sqrt(d_k)
    wq_s = raw["wq"] * scale
    bq_s = raw["bq"] * scale
    return {
        "h": h,
        "d_k": d_k,
        "w_qkv": jnp.concatenate([wq_s.T, raw["wk"].T, raw["wv"].T], axis=1),  # (D, 3D)
        "b_qkv": jnp.concatenate([bq_s, raw["bk"], raw["bv"]]),                # (3D,)
        "w_q": wq_s.T, "b_q": bq_s,
        "w_k": raw["wk"].T, "b_k": raw["bk"],
        "w_v": raw["wv"].T, "b_v": raw["bv"],
        "w_o": raw["wo"].T, "b_o": raw["bo"],
    }


# ------------------------------------------------------------------
# MultiHeadedAttention forward (eval mode).  Returns (B, S, d_model).
# ------------------------------------------------------------------
def multi_headed_attention(params, query, key, value, mask=None):
    B, Sq, D = query.shape
    Skv = key.shape[1]
    h, d_k = params["h"], params["d_k"]

    if (query is key) and (query is value):
        # Self-attention: fused QKV projection — x read from HBM once.
        qkv = pallas_linear(query.reshape(B * Sq, D), params["w_qkv"], params["b_qkv"])
        qkv = qkv.reshape(B, Sq, 3, h, d_k).transpose(2, 0, 3, 1, 4)  # (3, B, h, S, d_k)
        q, k, v = qkv[0], qkv[1], qkv[2]
    else:
        def proj(x, w, b, S):
            y = pallas_linear(x.reshape(B * S, D), w, b)
            return y.reshape(B, S, h, d_k).transpose(0, 2, 1, 3)      # (B, h, S, d_k)
        q = proj(query, params["w_q"], params["b_q"], Sq)
        k = proj(key, params["w_k"], params["b_k"], Skv)
        v = proj(value, params["w_v"], params["b_v"], Skv)

    # Mask -> additive f32 bias with its natural batch extent (no broadcast to B).
    # Equivalent to PyTorch's mask.unsqueeze(1) + masked_fill(mask == 0, -1e9).
    if mask is None:
        bias = None
    else:
        m = mask if mask.ndim == 3 else mask[None]
        bias = jnp.where(m == 0, jnp.float32(-1e9), jnp.float32(0.0))
        bias = jnp.broadcast_to(bias, (bias.shape[0], Sq, Skv))

    # TODO(synk): training-mode dropout on attention probs not implemented (eval mode).
    x = pallas_flash_attention(q, k, v, bias)             # (B, h, Sq, d_k)
    x = x.transpose(0, 2, 1, 3).reshape(B, Sq, D)         # merge heads

    out = pallas_linear(x.reshape(B * Sq, D), params["w_o"], params["b_o"])
    return out.reshape(B, Sq, D)


# ------------------------------------------------------------------
# Pure-JAX reference (mirrors the PyTorch math) for correctness checking.
# ------------------------------------------------------------------
def _reference(raw, query, key, value, mask=None):
    B, S, D = query.shape
    h = raw["h"]
    d_k = D // h

    def lin(x, w, b):
        return x @ w.T + b

    q = lin(query, raw["wq"], raw["bq"]).reshape(B, -1, h, d_k).transpose(0, 2, 1, 3)
    k = lin(key, raw["wk"], raw["bk"]).reshape(B, -1, h, d_k).transpose(0, 2, 1, 3)
    v = lin(value, raw["wv"], raw["bv"]).reshape(B, -1, h, d_k).transpose(0, 2, 1, 3)

    scores = jnp.einsum("bhqd,bhkd->bhqk", q, k) / math.sqrt(d_k)
    if mask is not None:
        scores = jnp.where(mask[:, None, :, :] == 0, -1e9, scores)
    p = jax.nn.softmax(scores, axis=-1)
    x = jnp.einsum("bhqk,bhkd->bhqd", p, v).transpose(0, 2, 1, 3).reshape(B, -1, D)
    return lin(x, raw["wo"], raw["bo"])


# ------------------------------------------------------------------
# Main
# ------------------------------------------------------------------
if __name__ == "__main__":
    B, S, D, H = 2, 8, 32, 4  # batch, seq, d_model, heads (d_k = 8)

    key0 = jax.random.PRNGKey(0)
    keys = jax.random.split(key0, 12)
    scale = 1.0 / math.sqrt(D)

    raw_params = {
        "h": H,
        "wq": jax.random.normal(keys[0], (D, D), jnp.float32) * scale,
        "bq": jax.random.normal(keys[1], (D,), jnp.float32) * 0.01,
        "wk": jax.random.normal(keys[2], (D, D), jnp.float32) * scale,
        "bk": jax.random.normal(keys[3], (D,), jnp.float32) * 0.01,
        "wv": jax.random.normal(keys[4], (D, D), jnp.float32) * scale,
        "bv": jax.random.normal(keys[5], (D,), jnp.float32) * 0.01,
        "wo": jax.random.normal(keys[6], (D, D), jnp.float32) * scale,
        "bo": jax.random.normal(keys[7], (D,), jnp.float32) * 0.01,
    }
    params = prepare_params(raw_params)   # one-time weight prep (not per forward)

    x_self = jax.random.normal(keys[8], (B, S, D), jnp.float32)
    key_in = jax.random.normal(keys[9], (B, S, D), jnp.float32)
    val_in = jax.random.normal(keys[10], (B, S, D), jnp.float32)

    # Causal mask (B, S, S); broadcast over heads (PyTorch unsqueeze(1)).
    mask = jnp.tril(jnp.ones((S, S), jnp.int32))[None].repeat(B, axis=0)

    # 1) Self-attention: fused QKV projection path + masked attention.
    out_self = jax.block_until_ready(
        multi_headed_attention(params, x_self, x_self, x_self, mask=mask))
    ref_self = _reference(raw_params, x_self, x_self, x_self, mask=mask)
    assert out_self.shape == (B, S, D)
    assert jnp.allclose(out_self, ref_self, rtol=2e-3, atol=2e-3), "self-attn output mismatch"

    # 2) Cross-attention (different q/k/v tensors): separate projections, no mask
    #    (exercises the bias-free kernel specialization).
    out_cross = jax.block_until_ready(
        multi_headed_attention(params, x_self, key_in, val_in, mask=None))
    ref_cross = _reference(raw_params, x_self, key_in, val_in, mask=None)
    assert jnp.allclose(out_cross, ref_cross, rtol=2e-3, atol=2e-3), "cross-attn output mismatch"

    print("KERNEL_OK")
</pallas_src>

<mosaic_0001>
module attributes {stable_mosaic.version = 11 : i64} {
  func.func @_linear_kernel(%arg0: i32, %arg1: i32, %arg2: i32, %arg3: memref<16x32xf32, #tpu.memory_space<vmem>>, %arg4: memref<32x96xf32, #tpu.memory_space<vmem>>, %arg5: memref<1x96xf32, #tpu.memory_space<vmem>>, %arg6: memref<16x96xf32, #tpu.memory_space<vmem>>, %arg7: memref<16x96xf32, #tpu.memory_space<vmem>>) attributes {dimension_semantics = [#tpu.dimension_semantics<parallel>, #tpu.dimension_semantics<parallel>, #tpu.dimension_semantics<arbitrary>], iteration_bounds = array<i64: 1, 1, 1>, scalar_prefetch = 0 : i64, scratch_operands = 1 : i64, tpu.core_type = #tpu.core_type<tc>, window_params = [{transform_indices = @transform_0, window_bounds = array<i64: 16, 32>}, {transform_indices = @transform_1, window_bounds = array<i64: 32, 96>}, {transform_indices = @transform_2, window_bounds = array<i64: 1, 96>}, {transform_indices = @transform_3, window_bounds = array<i64: 16, 96>}]} {
    %c0_i32 = arith.constant 0 : i32
    %0 = arith.cmpi eq, %arg2, %c0_i32 : i32
    %1 = arith.extui %0 : i1 to i32
    %c0_i32_0 = arith.constant 0 : i32
    %2 = arith.cmpi ne, %1, %c0_i32_0 : i32
    scf.if %2 {
      %cst_10 = arith.constant 0.000000e+00 : f32
      %12 = vector.broadcast %cst_10 : f32 to vector<16x96xf32>
      %c0_11 = arith.constant 0 : index
      %c0_12 = arith.constant 0 : index
      %13 = vector.load %arg7[%c0_11, %c0_12] : memref<16x96xf32, #tpu.memory_space<vmem>>, vector<16x96xf32>
      tpu.vector_store %arg7[%c0_11, %c0_12], %12 {strides = array<i32>} : memref<16x96xf32, #tpu.memory_space<vmem>>, vector<16x96xf32>,
    } else {
    }
    %c0 = arith.constant 0 : index
    %c0_1 = arith.constant 0 : index
    %3 = vector.load %arg7[%c0, %c0_1] : memref<16x96xf32, #tpu.memory_space<vmem>>, vector<16x96xf32>
    %c0_2 = arith.constant 0 : index
    %c0_3 = arith.constant 0 : index
    %4 = vector.load %arg3[%c0_2, %c0_3] : memref<16x32xf32, #tpu.memory_space<vmem>>, vector<16x32xf32>
    %c0_4 = arith.constant 0 : index
    %c0_5 = arith.constant 0 : index
    %5 = vector.load %arg4[%c0_4, %c0_5] : memref<32x96xf32, #tpu.memory_space<vmem>>, vector<32x96xf32>
    %cst = arith.constant dense<0.000000e+00> : vector<16x96xf32>
    %6 = tpu.matmul %4, %5, %cst {dimension_numbers = #tpu.dot_dimension_numbers<[1], [0], [0], [1], [0, 0, 1, 1], [], []>} : vector<16x32xf32>, vector<32x96xf32>, vector<16x96xf32> -> vector<16x96xf32>
    %7 = arith.addf %3, %6 : vector<16x96xf32>
    %c0_6 = arith.constant 0 : index
    %c0_7 = arith.constant 0 : index
    %8 = vector.load %arg7[%c0_6, %c0_7] : memref<16x96xf32, #tpu.memory_space<vmem>>, vector<16x96xf32>
    tpu.vector_store %arg7[%c0_6, %c0_7], %7 {strides = array<i32>} : memref<16x96xf32, #tpu.memory_space<vmem>>, vector<16x96xf32>,
    %c0_i32_8 = arith.constant 0 : i32
    %9 = arith.cmpi eq, %arg2, %c0_i32_8 : i32
    %10 = arith.extui %9 : i1 to i32
    %c0_i32_9 = arith.constant 0 : i32
    %11 = arith.cmpi ne, %10, %c0_i32_9 : i32
    scf.if %11 {
      %c0_10 = arith.constant 0 : index
      %c0_11 = arith.constant 0 : index
      %12 = vector.load %arg7[%c0_10, %c0_11] : memref<16x96xf32, #tpu.memory_space<vmem>>, vector<16x96xf32>
      %c0_12 = arith.constant 0 : index
      %c0_13 = arith.constant 0 : index
      %13 = vector.load %arg5[%c0_12, %c0_13] : memref<1x96xf32, #tpu.memory_space<vmem>>, vector<1x96xf32>
      %14 = vector.broadcast %13 : vector<1x96xf32> to vector<16x96xf32>
      %15 = arith.addf %12, %14 : vector<16x96xf32>
      %c0_14 = arith.constant 0 : index
      %c0_15 = arith.constant 0 : index
      %16 = vector.load %arg6[%c0_14, %c0_15] : memref<16x96xf32, #tpu.memory_space<vmem>>, vector<16x96xf32>
      tpu.vector_store %arg6[%c0_14, %c0_15], %15 {strides = array<i32>} : memref<16x96xf32, #tpu.memory_space<vmem>>, vector<16x96xf32>,
    } else {
    }
    return
  }
  func.func @transform_0(%arg0: i32, %arg1: i32, %arg2: i32) -> (i32, i32) {
    %c0_i32 = arith.constant 0 : i32
    return %arg0, %arg2 : i32, i32
  }
  func.func @transform_1(%arg0: i32, %arg1: i32, %arg2: i32) -> (i32, i32) {
    %c0_i32 = arith.constant 0 : i32
    return %arg2, %arg1 : i32, i32
  }
  func.func @transform_2(%arg0: i32, %arg1: i32, %arg2: i32) -> (i32, i32) {
    %c0_i32 = arith.constant 0 : i32
    %c0_i32_0 = arith.constant 0 : i32
    return %c0_i32, %arg1 : i32, i32
  }
  func.func @transform_3(%arg0: i32, %arg1: i32, %arg2: i32) -> (i32, i32) {
    %c0_i32 = arith.constant 0 : i32
    return %arg0, %arg1 : i32, i32
  }
}

</mosaic_0001>

<bundles_post_ra>
// kernel: tpu_custom_call.1
= control target key start
LH: loop header
LB: loop body
LE: loop exit
PB: predicated region body
PF: predicated region fallthrough
CT: control target
= control target key end

     0   :  { %8 = vsyncpa [#allocation4], 0  ;;  %s365_s0 = inlined_call_operand.hbm [shape: f32[16,32], index: 0, kind: input, shape index: {}]   ;;  %s366_s1 = inlined_call_operand.hbm [shape: f32[32,96], index: 1, kind: input, shape index: {}]   ;;  %s367_s2 = inlined_call_operand.vmem [shape: f32[1,96], index: 2, kind: input, shape index: {}]   ;;  %s368_s3 = inlined_call_operand.hbm [shape: f32[16,96], index: 3, kind: output, shape index: {}]  }
   0x1   :  { %9 = vsyncpa [#allocation7], 0 }
   0x2   :  { %10 = vsyncpa [#allocation5], 0  ;;  %s285_s12 = smov [#allocation3]   ;;  %s213_s16 = scalar_lea.hbm %s365_s0, 256 }
   0x3   :  { %s16_s13 = sshll.u32 %s285_s12, 4  ;;  %p214_p0 = scmp.ne.s32.totalorder %s365_s0, %s213_s16  ;;  %s17_s13 = int_to_ptr.vmem [resolvable:$true] %s16_s13 }
   0x4   :  { %p217_p1 = scmp.lt.u32.totalorder %s213_s16, %s365_s0 }
   0x6   :  { %p219_p2 = pnand %p217_p1, %p214_p0 }
   0x8   :  { %222 = shalt.err (!%p219_p2)
}
   0x9   :  { %s223_s21 = scalar_lea.vmem %s17_s13, 256  ;;  %p228_p4 = scmp.lt.s32.totalorder %s17_s13, %s17_s13 }
   0xa   :  { %p224_p3 = scmp.ne.s32.totalorder %s17_s13, %s223_s21  ;;  %p229_p5 = scmp.lt.s32.totalorder %s223_s21, %s223_s21 }
   0xc   :  { %p230_p6 = por %p229_p5, %p228_p4 }
   0xe   :  { %p231_p7 = pnand %p230_p6, %p224_p3 }
  0x10   :  { %234 = shalt.err (!%p231_p7)
}
  0x11   :  { %s286_s22 = smov 128   ;;  %s287_s23 = smov 8  }
  0x12   :  { %22 = dma.hbm_to_vmem [thread:$0]  %s365_s0, 256, %s17_s13, [#allocation4], %s286_s22, %s286_s22, %s287_s23  }
  0x13   :  { %s288_s26 = smov [#allocation6]   ;;  %s235_s30 = scalar_lea.hbm %s366_s1, 512 }
  0x14   :  { %s28_s27 = sshll.u32 %s288_s26, 4  ;;  %p236_p8 = scmp.ne.s32.totalorder %s366_s1, %s235_s30  ;;  %s29_s27 = int_to_ptr.vmem [resolvable:$true] %s28_s27 }
  0x15   :  { %p239_p9 = scmp.lt.u32.totalorder %s235_s30, %s366_s1 }
  0x17   :  { %p241_p10 = pnand %p239_p9, %p236_p8 }
  0x19   :  { %244 = shalt.err (!%p241_p10)
}
  0x1a   :  { %s245_s8 = scalar_lea.vmem %s29_s27, 512  ;;  %p250_p12 = scmp.lt.s32.totalorder %s29_s27, %s29_s27 }
  0x1b   :  { %p246_p11 = scmp.ne.s32.totalorder %s29_s27, %s245_s8  ;;  %p251_p13 = scmp.lt.s32.totalorder %s245_s8, %s245_s8 }
  0x1d   :  { %p252_p0 = por %p251_p13, %p250_p12 }
  0x1f   :  { %p253_p1 = pnand %p252_p0, %p246_p11 }
  0x21   :  { %256 = shalt.err (!%p253_p1)
}
  0x22   :  { %34 = dma.hbm_to_vmem [thread:$0]  %s366_s1, 512, %s29_s27, [#allocation7], %s286_s22, %s286_s22, %s287_s23  }
  0x23   :  { %279 = dma.done.wait [#allocation4], 256  }
  0x24   :  { %280 = vsyncadd [#allocation4], 4294967040 }
  0x25   :  { %281 = dma.done.wait [#allocation7], 512  }
  0x26   :  { %282 = vsyncadd [#allocation7], 4294966784  ;;  %vm47_vm0 = vcmask 785408   ;;  %v289_v0 = vmov 0.0   ;;  %vm58_vm1 = vcmask 261120   ;;  %v54_v1 = vld [vmem:[#allocation6] sm:$0xff] }
  0x27   :  { %49 = vst.msk [vmem:[#allocation2 + $0x8] sm:$0xff] %vm47_vm0, %v289_v0  ;;  %48 = vst.msk [vmem:[#allocation2] sm:$0xff] %vm47_vm0, %v289_v0  ;;  %v55_v2 = vld [vmem:[#allocation6 + $0x8] sm:$0xff]  ;;  %v56_v3 = vld [vmem:[#allocation6 + $0x10] sm:$0xff]  ;;  %s290_s11 = smov [#allocation8]  }
  0x28   :  { %v199_v4 = vpack.c.bf16 %v55_v2, %v54_v1  ;;  %v57_v5 = vld [vmem:[#allocation6 + $0x18] sm:$0xff]  ;;  %v52_v6 = vld [vmem:[#allocation3] sm:$0xff]  ;;  %v181_v15 = vld [vmem:[%s367_s2] ss:$0 sm:$0xff]  ;;  %s166_s12 = sshll.u32 %s290_s11, 4  ;;  %s167_s12 = int_to_ptr.vmem [resolvable:$true] %s166_s12 }
  0x29   :  { %v203_v7 = vpack.c.bf16 %v57_v5, %v56_v3  ;;  %196 = vmatprep.mubr.msk.f32.mxu0 %vm58_vm1, %v52_v6  ;;  %v53_v8 = vld [vmem:[#allocation3 + $0x8] sm:$0xff]  ;;  %s257_s13 = scalar_lea.vmem %s167_s12, 256  ;;  %p262_p3 = scmp.lt.s32.totalorder %s167_s12, %s167_s12 }
  0x2a   :  { %200 = vmatprep.subr.bf16.mxu0 %v199_v4  ;;  %p258_p2 = scmp.ne.s32.totalorder %s167_s12, %s257_s13  ;;  %p263_p4 = scmp.lt.s32.totalorder %s257_s13, %s257_s13 }
  0x2b   :  { %202 = vmatpush3.bf16.msra.mxu0 %v199_v4 }
  0x2c   :  { %204 = vmatprep.subr.bf16.mxu0 %v203_v7  ;;  %p264_p5 = por %p263_p4, %p262_p3 }
  0x2e   :  { %v51_v9 = vld [vmem:[#allocation2 + $0x8] sm:$0xff]  ;;  %v50_v10 = vld [vmem:[#allocation2] sm:$0xff]  ;;  %p265_p6 = pnand %p264_p5, %p258_p2 }
  0x2f   :  { %206 = vmatpush3.bf16.msra.mxu0 %v203_v7 }
  0x32   :  { %197 = vmatmul.mubr.msk.f32.vlgmr.msra.gmra.mrb[0].mxu0 %vm58_vm1, %v53_v8 }
 0x105   :  { %v198_v11 = vpop.f32.mrb[0].mxu0 }
 0x106   :  { %v141_v12 = vadd.f32 %v198_v11, %v51_v9  ;;  %v131_v13 = vpop.f32.mrb[1].mxu0 }
 0x107   :  { %v140_v14 = vadd.f32 %v131_v13, %v50_v10 }
 0x108   :  { %144 = vst.msk [vmem:[#allocation2 + $0x8] sm:$0xff] %vm47_vm0, %v141_v12 }
 0x109   :  { %143 = vst.msk [vmem:[#allocation2] sm:$0xff] %vm47_vm0, %v140_v14 }
 0x10f   :  { %v149_v16 = vld [vmem:[#allocation2 + $0x8] sm:$0xff] }
 0x110   :  { %v148_v17 = vld [vmem:[#allocation2] sm:$0xff]  ;;  %v158_v18 = vadd.f32 %v181_v15, %v149_v16 }
 0x111   :  { %v157_v19 = vadd.f32 %v181_v15, %v148_v17 }
 0x112   :  { %160 = vst.msk [vmem:[#allocation8 + $0x8] sm:$0xff] %vm47_vm0, %v158_v18 }
 0x113   :  { %159 = vst.msk [vmem:[#allocation8] sm:$0xff] %vm47_vm0, %v157_v19 }
 0x114   :  { %268 = shalt.err (!%p265_p6)
}
 0x115   :  { %s269_s15 = scalar_lea.hbm %s368_s3, 256 }
 0x116   :  { %p270_p7 = scmp.ne.s32.totalorder %s368_s3, %s269_s15  ;;  %p273_p8 = scmp.lt.u32.totalorder %s269_s15, %s368_s3 }
 0x118   :  { %p275_p9 = pnand %p273_p8, %p270_p7 }
 0x11a   :  { %278 = shalt.err (!%p275_p9)
}
 0x11b   :  { %172 = dma.vmem_to_hbm [thread:$0]  %s167_s12, 256, %s368_s3, [#allocation5], %s286_s22, %s286_s22, %s287_s23  }
 0x11c   :  { %283 = dma.done.wait [#allocation5], 256  }
 0x11d   :  { %284 = vsyncadd [#allocation5], 4294967040 }
 0x11e   :  { %176 = vsyncpa [#allocation4], 1 }
 0x11f   :  { %177 = vsyncpa [#allocation7], 1 }
 0x120   :  { %178 = vsyncpa [#allocation5], 1 }

</bundles_post_ra>
